<compile_context>
chip_gen: v6e
topology: v6e:2x2x1
jax: 0.10.0
libtpu: 0.0.40
codegen_flags: <defaults>
</compile_context>

<pallas_src>
import functools

import jax
import jax.numpy as jnp
from jax.experimental import pallas as pl
from jax.experimental.pallas import tpu as pltpu

# Problem sizes (small, consistent with a C51 dueling head).
BATCH = 8
HIDDEN = 32
N_ACTIONS = 4
ATOMS = 51


def _round_up(x, m):
    return (x + m - 1) // m * m


# --------------------------------------------------------------------------
# Kernel: the entire dueling head after the algebraic fold.
# --------------------------------------------------------------------------
def fused_head_kernel(f_ref, wf_ref, bf_ref, o_ref):
    """One MXU matmul + bias add + full-tile store."""
    w = wf_ref[...]
    f = f_ref[...]
    if f.dtype != w.dtype:
        # bf16-weight path: cast activations so the MXU runs a native bf16
        # matmul; accumulation stays f32 via preferred_element_type.
        f = f.astype(w.dtype)
    acc = jnp.dot(f, w, preferred_element_type=jnp.float32)
    b = bf_ref[...]
    if b.shape[0] != acc.shape[0]:
        b = b[:1]  # fall back to a (1, N) sublane-broadcast add for fat tiles
    o_ref[...] = (acc + b).astype(o_ref.dtype)


# --------------------------------------------------------------------------
# One-time fold (call at module init, NOT per forward).
# --------------------------------------------------------------------------
def fuse_dueling_head(wv, bv, wa, ba, *, n_actions, atoms,
                      weight_dtype=jnp.float32):
    """Fold value/advantage/mean into a single Linear head.

    out[:, a*At:(a+1)*At] = f @ (Wa_a + Wv - mean_a Wa_a)
                            + (ba_a + bv - mean_a ba_a)

    Returns (w_fused, b_fused, out_dim). w_fused is lane-padded to a multiple
    of 128; b_fused is f32 and pre-broadcast to 8 sublanes.
    """
    hidden = wv.shape[0]
    out_dim = n_actions * atoms

    # Fold in f32; cast to the requested weight dtype last.
    wa3 = wa.reshape(hidden, n_actions, atoms).astype(jnp.float32)
    ba3 = ba.reshape(1, n_actions, atoms).astype(jnp.float32)
    w_corr = wv.reshape(hidden, 1, atoms).astype(jnp.float32) - wa3.mean(
        axis=1, keepdims=True)
    b_corr = bv.reshape(1, 1, atoms).astype(jnp.float32) - ba3.mean(
        axis=1, keepdims=True)
    w_fused = (wa3 + w_corr).reshape(hidden, out_dim)
    b_fused = (ba3 + b_corr).reshape(1, out_dim)

    # Lane-dense output: pad 204 -> 256 (multiple of 128 lanes).
    out_pad = _round_up(out_dim, 128)
    if out_pad != out_dim:
        w_fused = jnp.pad(w_fused, ((0, 0), (0, out_pad - out_dim)))
        b_fused = jnp.pad(b_fused, ((0, 0), (0, out_pad - out_dim)))

    w_fused = w_fused.astype(weight_dtype)          # bf16 on v6e/v7x if wanted
    b_fused = jnp.tile(b_fused, (8, 1))             # pre-broadcast to 8 sublanes
    return w_fused, b_fused, out_dim


def _pick_batch_tile(batch, block_b):
    """Fat single tile when it fits; >= 2 steps only for very large batches
    (so the v7x megacore 'parallel' axis actually has work to shard)."""
    bpad = _round_up(max(batch, 1), 8)
    tb = min(block_b, bpad)
    if tb == bpad and bpad >= 1024:
        tb = _round_up(bpad // 2, 8)
    bpad = _round_up(bpad, tb)
    return bpad, tb


# --------------------------------------------------------------------------
# Per-forward path (only `features` changes call to call).
# --------------------------------------------------------------------------
def dueling_forward(features, w_fused, b_fused, out_dim, *, block_b=1024):
    batch, hidden = features.shape
    out_pad = w_fused.shape[1]

    bpad, tb = _pick_batch_tile(batch, block_b)
    f = features
    if bpad != batch:
        f = jnp.pad(f, ((0, bpad - batch), (0, 0)))

    out = pl.pallas_call(
        fused_head_kernel,
        out_shape=jax.ShapeDtypeStruct((bpad, out_pad), jnp.float32),
        grid_spec=pltpu.PrefetchScalarGridSpec(
            num_scalar_prefetch=0,
            grid=(bpad // tb,),
            in_specs=[
                pl.BlockSpec((tb, hidden), lambda i: (i, 0)),       # features
                pl.BlockSpec((hidden, out_pad), lambda i: (0, 0)),  # fused W
                pl.BlockSpec((8, out_pad), lambda i: (0, 0)),       # fused b
            ],
            out_specs=pl.BlockSpec((tb, out_pad), lambda i: (i, 0)),
        ),
        compiler_params=pltpu.CompilerParams(
            # Shards the batch axis across both TensorCores on v7x whenever
            # the grid has >= 2 steps; harmless no-op for a single step.
            dimension_semantics=("parallel",),
        ),
    )(f, w_fused, b_fused)

    # Strip batch / lane padding with plain XLA.
    return out[:batch, :out_dim]


def categorical_dueling(features, wv, bv, wa, ba,
                        *, n_actions=N_ACTIONS, atoms=ATOMS,
                        weight_dtype=jnp.float32, block_b=1024):
    """Convenience one-shot wrapper (fold + forward). Prefer caching the fold
    with `fuse_dueling_head` and reusing `dueling_forward` in a hot loop."""
    w_fused, b_fused, out_dim = fuse_dueling_head(
        wv, bv, wa, ba, n_actions=n_actions, atoms=atoms,
        weight_dtype=weight_dtype)
    return dueling_forward(features, w_fused, b_fused, out_dim,
                           block_b=block_b)


def reference(features, wv, bv, wa, ba, *, n_actions=N_ACTIONS, atoms=ATOMS):
    """Pure-JAX reference mirroring the PyTorch forward exactly."""
    b = features.shape[0]
    value = features @ wv + bv                                    # (B, atoms)
    adv = (features @ wa + ba).reshape(b, n_actions, atoms)
    adv_mean = adv.mean(axis=1, keepdims=True)
    return (value.reshape(b, 1, atoms) + adv - adv_mean).reshape(b, -1)


if __name__ == "__main__":
    key = jax.random.PRNGKey(0)
    k_f, k_wv, k_bv, k_wa, k_ba = jax.random.split(key, 5)

    features = jax.random.normal(k_f, (BATCH, HIDDEN), dtype=jnp.float32)

    # Deterministic Linear-style init (U(-1/sqrt(in), 1/sqrt(in))).
    bound = 1.0 / (HIDDEN ** 0.5)
    wv = jax.random.uniform(k_wv, (HIDDEN, ATOMS), jnp.float32, -bound, bound)
    bv = jax.random.uniform(k_bv, (1, ATOMS), jnp.float32, -bound, bound)
    wa = jax.random.uniform(k_wa, (HIDDEN, N_ACTIONS * ATOMS), jnp.float32,
                            -bound, bound)
    ba = jax.random.uniform(k_ba, (1, N_ACTIONS * ATOMS), jnp.float32,
                            -bound, bound)

    ref = reference(features, wv, bv, wa, ba)

    # ---- f32 path: fold cached once, jitted forward takes only `features`. --
    w_f32, b_f32, out_dim = fuse_dueling_head(
        wv, bv, wa, ba, n_actions=N_ACTIONS, atoms=ATOMS,
        weight_dtype=jnp.float32)
    w_f32, b_f32 = jax.block_until_ready((w_f32, b_f32))  # cached params

    fwd_f32 = jax.jit(functools.partial(
        dueling_forward, w_fused=w_f32, b_fused=b_f32, out_dim=out_dim))
    out_f32 = jax.block_until_ready(fwd_f32(features))

    assert out_f32.shape == (BATCH, N_ACTIONS * ATOMS)
    assert jnp.allclose(out_f32, ref, atol=1e-5, rtol=1e-5), \
        "f32 mismatch vs reference"

    # ---- bf16-weight path (v6e/v7x): fold in f32, cast last, f32 accum. ----
    w_bf16, b_bf16, _ = fuse_dueling_head(
        wv, bv, wa, ba, n_actions=N_ACTIONS, atoms=ATOMS,
        weight_dtype=jnp.bfloat16)
    fwd_bf16 = jax.jit(functools.partial(
        dueling_forward, w_fused=w_bf16, b_fused=b_bf16, out_dim=out_dim))
    out_bf16 = jax.block_until_ready(fwd_bf16(features))

    assert out_bf16.shape == (BATCH, N_ACTIONS * ATOMS)
    assert jnp.allclose(out_bf16, ref, atol=2e-2, rtol=2e-2), \
        "bf16 mismatch vs reference (beyond bf16 tolerance)"

    print("KERNEL_OK")
</pallas_src>

<mosaic_0001>
module attributes {stable_mosaic.version = 11 : i64} {
  func.func @fused_head_kernel(%arg0: i32, %arg1: memref<8x32xf32, #tpu.memory_space<vmem>>, %arg2: memref<32x256xf32, #tpu.memory_space<vmem>>, %arg3: memref<8x256xf32, #tpu.memory_space<vmem>>, %arg4: memref<8x256xf32, #tpu.memory_space<vmem>>) attributes {dimension_semantics = [#tpu.dimension_semantics<parallel>], iteration_bounds = array<i64: 1>, scalar_prefetch = 0 : i64, scratch_operands = 0 : i64, tpu.core_type = #tpu.core_type<tc>, window_params = [{transform_indices = @transform_0, window_bounds = array<i64: 8, 32>}, {pipeline_mode = #tpu.pipeline_mode<synchronous>, transform_indices = @transform_1, window_bounds = array<i64: 32, 256>}, {pipeline_mode = #tpu.pipeline_mode<synchronous>, transform_indices = @transform_2, window_bounds = array<i64: 8, 256>}, {transform_indices = @transform_3, window_bounds = array<i64: 8, 256>}]} {
    %c0 = arith.constant 0 : index
    %c0_0 = arith.constant 0 : index
    %0 = vector.load %arg2[%c0, %c0_0] : memref<32x256xf32, #tpu.memory_space<vmem>>, vector<32x256xf32>
    %c0_1 = arith.constant 0 : index
    %c0_2 = arith.constant 0 : index
    %1 = vector.load %arg1[%c0_1, %c0_2] : memref<8x32xf32, #tpu.memory_space<vmem>>, vector<8x32xf32>
    %cst = arith.constant dense<0.000000e+00> : vector<8x256xf32>
    %2 = tpu.matmul %1, %0, %cst {dimension_numbers = #tpu.dot_dimension_numbers<[1], [0], [0], [1], [0, 0, 1, 1], [], []>} : vector<8x32xf32>, vector<32x256xf32>, vector<8x256xf32> -> vector<8x256xf32>
    %c0_3 = arith.constant 0 : index
    %c0_4 = arith.constant 0 : index
    %3 = vector.load %arg3[%c0_3, %c0_4] : memref<8x256xf32, #tpu.memory_space<vmem>>, vector<8x256xf32>
    %4 = arith.addf %2, %3 : vector<8x256xf32>
    %c0_5 = arith.constant 0 : index
    %c0_6 = arith.constant 0 : index
    %5 = vector.load %arg4[%c0_5, %c0_6] : memref<8x256xf32, #tpu.memory_space<vmem>>, vector<8x256xf32>
    tpu.vector_store %arg4[%c0_5, %c0_6], %4 {strides = array<i32>} : memref<8x256xf32, #tpu.memory_space<vmem>>, vector<8x256xf32>,
    return
  }
  func.func @transform_0(%arg0: i32) -> (i32, i32) {
    %c0_i32 = arith.constant 0 : i32
    %c0_i32_0 = arith.constant 0 : i32
    return %arg0, %c0_i32 : i32, i32
  }
  func.func @transform_1(%arg0: i32) -> (i32, i32) {
    %c0_i32 = arith.constant 0 : i32
    %c0_i32_0 = arith.constant 0 : i32
    %c0_i32_1 = arith.constant 0 : i32
    return %c0_i32, %c0_i32_0 : i32, i32
  }
  func.func @transform_2(%arg0: i32) -> (i32, i32) {
    %c0_i32 = arith.constant 0 : i32
    %c0_i32_0 = arith.constant 0 : i32
    %c0_i32_1 = arith.constant 0 : i32
    return %c0_i32, %c0_i32_0 : i32, i32
  }
  func.func @transform_3(%arg0: i32) -> (i32, i32) {
    %c0_i32 = arith.constant 0 : i32
    %c0_i32_0 = arith.constant 0 : i32
    return %arg0, %c0_i32 : i32, i32
  }
}

</mosaic_0001>

<bundles_post_ra>
// kernel: dueling_forward.1
= control target key start
LH: loop header
LB: loop body
LE: loop exit
PB: predicated region body
PF: predicated region fallthrough
CT: control target
= control target key end

     0   :  { %8 = vsyncpa [#allocation3], 0  ;;  %s289_s0 = inlined_call_operand.hbm [shape: f32[8,32], index: 0, kind: input, shape index: {}]   ;;  %s290_s1 = inlined_call_operand.hbm [shape: f32[32,256], index: 1, kind: input, shape index: {}]   ;;  %s291_s2 = inlined_call_operand.hbm [shape: f32[8,256], index: 2, kind: input, shape index: {}]   ;;  %s292_s3 = inlined_call_operand.hbm [shape: f32[8,256], index: 3, kind: output, shape index: {}]  }
   0x1   :  { %9 = vsyncpa [#allocation6], 0 }
   0x2   :  { %10 = vsyncpa [#allocation4], 0  ;;  %s250_s12 = smov [#allocation5]  }
   0x3   :  { %s26_s13 = sshll.u32 %s250_s12, 4  ;;  %s27_s13 = int_to_ptr.vmem [resolvable:$true] %s26_s13 }
   0x4   :  { %s172_s14 = scalar_lea.vmem %s27_s13, 1024  ;;  %p177_p1 = scmp.lt.s32.totalorder %s27_s13, %s27_s13 }
   0x5   :  { %p173_p0 = scmp.ne.s32.totalorder %s27_s13, %s172_s14  ;;  %p178_p2 = scmp.lt.s32.totalorder %s172_s14, %s172_s14 }
   0x7   :  { %p179_p3 = por %p178_p2, %p177_p1 }
   0x9   :  { %p180_p4 = pnand %p179_p3, %p173_p0 }
   0xb   :  { %183 = shalt.err (!%p180_p4)
}
   0xc   :  { %s251_s15 = smov 256   ;;  %s252_s16 = smov 16  }
   0xd   :  { %32 = dma.hbm_to_vmem [thread:$0]  %s290_s1, 1024, %s27_s13, [#allocation6], %s251_s15, %s251_s15, %s252_s16  }
   0xe   :  { %s253_s19 = smov [#allocation2]   ;;  %s254_s21 = smov [#allocation7]  }
   0xf   :  { %s17_s20 = sshll.u32 %s253_s19, 4  ;;  %s39_s22 = sshll.u32 %s254_s21, 4  ;;  %s18_s20 = int_to_ptr.vmem [resolvable:$true] %s17_s20  ;;  %s40_s22 = int_to_ptr.vmem [resolvable:$true] %s39_s22 }
  0x10   :  { %s192_s23 = scalar_lea.vmem %s18_s20, 128  ;;  %p197_p6 = scmp.lt.s32.totalorder %s18_s20, %s18_s20 }
  0x11   :  { %p193_p5 = scmp.ne.s32.totalorder %s18_s20, %s192_s23  ;;  %p198_p7 = scmp.lt.s32.totalorder %s192_s23, %s192_s23 }
  0x13   :  { %p199_p8 = por %p198_p7, %p197_p6 }
  0x15   :  { %p200_p9 = pnand %p199_p8, %p193_p5 }
  0x17   :  { %203 = shalt.err (!%p200_p9)
}
  0x18   :  { %20 = dma.hbm_to_vmem [thread:$0]  %s289_s0, 128, %s18_s20, [#allocation3]  }
  0x19   :  { %s212_s26 = scalar_lea.vmem %s40_s22, 256  ;;  %p217_p11 = scmp.lt.s32.totalorder %s40_s22, %s40_s22 }
  0x1a   :  { %p213_p10 = scmp.ne.s32.totalorder %s40_s22, %s212_s26  ;;  %p218_p12 = scmp.lt.s32.totalorder %s212_s26, %s212_s26 }
  0x1c   :  { %p219_p13 = por %p218_p12, %p217_p11 }
  0x1e   :  { %p220_p0 = pnand %p219_p13, %p213_p10 }
  0x20   :  { %223 = shalt.err (!%p220_p0)
}
  0x21   :  { %42 = dma.hbm_to_vmem [thread:$0]  %s291_s2, 256, %s40_s22, [#allocation6]  }
  0x22   :  { %244 = dma.done.wait [#allocation3], 128  }
  0x23   :  { %245 = vsyncadd [#allocation3], 4294967168 }
  0x24   :  { %246 = dma.done.wait [#allocation6], 1280  }
  0x25   :  { %247 = vsyncadd [#allocation6], 4294966016  ;;  %v255_v0 = vmov 0.0   ;;  %v59_v1 = vld [vmem:[#allocation5 + $0x38] sm:$0xff]  ;;  %v58_v2 = vld [vmem:[#allocation5 + $0x30] sm:$0xff]  ;;  %vm63_vm0 = vcmask 261120  }
  0x26   :  { %131 = vmatprep.mubr.f32.mxu0 %v255_v0  ;;  %v57_v3 = vld [vmem:[#allocation5 + $0x28] sm:$0xff]  ;;  %91 = vmatprep.subr.mxu0 %v59_v1  ;;  %v56_v4 = vld [vmem:[#allocation5 + $0x20] sm:$0xff]  ;;  %v55_v5 = vld [vmem:[#allocation5 + $0x18] sm:$0xff]  ;;  %s256_s0 = smov [#allocation8]  }
  0x27   :  { %92 = vmatpush1.msra.mxu0 %v58_v2  ;;  %v54_v6 = vld [vmem:[#allocation5 + $0x10] sm:$0xff]  ;;  %v53_v7 = vld [vmem:[#allocation5 + $0x8] sm:$0xff]  ;;  %v52_v8 = vld [vmem:[#allocation5] sm:$0xff]  ;;  %s146_s2 = sshll.u32 %s256_s0, 4  ;;  %s147_s2 = int_to_ptr.vmem [resolvable:$true] %s146_s2 }
  0x28   :  { %93 = vmatprep.subr.mxu0 %v57_v3  ;;  %v60_v9 = vld [vmem:[#allocation2] sm:$0xff]  ;;  %v61_v10 = vld [vmem:[#allocation7] sm:$0xff]  ;;  %v62_v12 = vld [vmem:[#allocation7 + $0x8] sm:$0xff]  ;;  %s224_s28 = scalar_lea.vmem %s147_s2, 256  ;;  %p229_p2 = scmp.lt.s32.totalorder %s147_s2, %s147_s2 }
  0x29   :  { %94 = vmatpush1.msra.mxu0 %v56_v4  ;;  %p225_p1 = scmp.ne.s32.totalorder %s147_s2, %s224_s28  ;;  %p230_p3 = scmp.lt.s32.totalorder %s224_s28, %s224_s28 }
  0x2a   :  { %95 = vmatprep.subr.mxu0 %v55_v5 }
  0x2b   :  { %96 = vmatpush1.msra.mxu0 %v54_v6  ;;  %p231_p4 = por %p230_p3, %p229_p2 }
  0x2c   :  { %97 = vmatprep.subr.mxu0 %v53_v7 }
  0x2d   :  { %98 = vmatpush1.msra.mxu0 %v52_v8  ;;  %p232_p5 = pnand %p231_p4, %p225_p1 }
  0x2e   :  { %156 = vmatmul.mubr.msk.f32.vlgmr.msra.gmra.mxu0 %vm63_vm0, %v60_v9 }
  0xee   :  { %v133_v11 = vpop.f32.mrf.mxu0 }
  0xef   :  { %v134_v13 = vadd.f32 %v133_v11, %v61_v10 }
  0xf0   :  { %v135_v14 = vpop.f32.mrf.mxu0 }
  0xf1   :  { %138 = vst [vmem:[#allocation8] sm:$0xff] %v134_v13  ;;  %v136_v15 = vadd.f32 %v135_v14, %v62_v12 }
  0xf3   :  { %139 = vst [vmem:[#allocation8 + $0x8] sm:$0xff] %v136_v15 }
  0xf4   :  { %235 = shalt.err (!%p232_p5)
}
  0xf5   :  { %149 = dma.vmem_to_hbm [thread:$0]  %s147_s2, 256, %s292_s3, [#allocation4]  }
  0xf6   :  { %248 = dma.done.wait [#allocation4], 256  }
  0xf7   :  { %249 = vsyncadd [#allocation4], 4294967040 }
  0xf8   :  { %153 = vsyncpa [#allocation3], 1 }
  0xf9   :  { %154 = vsyncpa [#allocation6], 1 }
  0xfa   :  { %155 = vsyncpa [#allocation4], 1 }

</bundles_post_ra>
